<compile_context>
chip_gen: v5e
topology: v5e:2x2
jax: 0.10.0
libtpu: 0.0.40
codegen_flags: <defaults>
</compile_context>

<pallas_src>
import functools

import numpy as np
import jax
import jax.numpy as jnp
from jax.experimental import pallas as pl
from jax.experimental.pallas import tpu as pltpu

# ---------------- sample-config constants (config.sample) ------------------
SIGMA_DATA = 16.0
SIGMA_MAX = 160.0
SIGMA_MIN = 4e-4
RHO = 7.0
NO_SAMPLE_STEPS_T = 3            # small for the demo
GAMMA_0 = 0.8
GAMMA_MIN = 1.0
NOISE_SCALE_LAMBDA = 1.003
STEP_SCALE_ETA = 1.5
S_TRANS = 1.0


# =====================  fused per-step diffusion kernel  ====================
def _fused_diffusion_step_kernel(params_ref, R_ref, t_ref,
                                 x_ref, mask_ref, eps_ref, o_ref):
    """One full sampling step, fused:
       CentreRandomAugmentation + noise injection + EDM skip scaling + Euler update.

    params_ref : SMEM (3,)     f32  [xi_scale, scale_skip, step_scale]
    R_ref      : SMEM (Bd*9,)  f32  flattened per-batch rotation matrices (row-major)
    t_ref      : SMEM (Bd*3,)  f32  flattened per-batch translation vectors
    x_ref      : VMEM (Bd,3,N) f32  current sample x
    mask_ref   : VMEM (Bd,1,N) f32  atom mask (0/1)
    eps_ref    : VMEM (Bd,3,N) f32  standard-normal noise
    o_ref      : VMEM (Bd,3,N) f32  updated sample
    """
    xi_scale = params_ref[0]
    scale_skip = params_ref[1]
    step_scale = params_ref[2]          # = eta * (c_tau - t_hat) / t_hat

    x = x_ref[...]                      # (Bd, 3, N)
    m = mask_ref[...]                   # (Bd, 1, N)
    eps = eps_ref[...]                  # (Bd, 3, N)

    # ---- CentreRandomAugmentation (Algorithm 19): masked centring ----
    denom = jnp.maximum(jnp.sum(m, axis=-1, keepdims=True), 1.0)     # (Bd,1,1)
    mean = jnp.sum(x * m, axis=-1, keepdims=True) / denom            # (Bd,3,1)
    xc = (x - mean) * m                                              # (Bd,3,N)

    bd = x_ref.shape[0]
    for b in range(bd):                 # Bd is small & static — unrolled at trace time
        xb0 = xc[b, 0:1, :]
        xb1 = xc[b, 1:2, :]
        xb2 = xc[b, 2:3, :]
        mb = m[b]                                                    # (1, N)
        for j in range(3):
            # rotation row j + translation from SMEM scalars: 9 scalar*vector FMAs / batch
            r0 = R_ref[b * 9 + j * 3 + 0]
            r1 = R_ref[b * 9 + j * 3 + 1]
            r2 = R_ref[b * 9 + j * 3 + 2]
            tj = t_ref[b * 3 + j]
            x_aug = (r0 * xb0 + r1 * xb1 + r2 * xb2 + tj) * mb       # (1, N)

            # noise injection; mask keeps padded atoms at exactly zero (the reference
            # re-zeroes them at the next augmentation, so valid-atom results and the
            # final output are identical)
            x_noisy = x_aug + (xi_scale * eps[b, j:j + 1, :]) * mb

            # EDM preconditioning: x_denoised = scale_skip*x_noisy + scale_out*r_update
            # TODO(synk): r_update = DiffusionModule(x_noisy*scale_in, t_hat, ...) is not
            #             provided; it is stubbed to zero, so the term is dropped here.
            x_denoised = scale_skip * x_noisy

            # Euler step: x_new = x_noisy + eta*(c_tau - t_hat)*(x_noisy - x_denoised)/t_hat
            o_ref[b, j:j + 1, :] = x_noisy + step_scale * (x_noisy - x_denoised)


def fused_diffusion_step(x_b3n, mask_b1n, eps_b3n, params, R_flat, t_flat):
    """params: (3,) f32 [xi_scale, scale_skip, step_scale]; R_flat: (Bd*9,); t_flat: (Bd*3,)."""
    Bd, _, N = x_b3n.shape
    smem = pltpu.MemorySpace.SMEM
    return pl.pallas_call(
        _fused_diffusion_step_kernel,
        out_shape=jax.ShapeDtypeStruct((Bd, 3, N), jnp.float32),
        grid=(1,),
        in_specs=[
            pl.BlockSpec((3,), lambda i: (0,), memory_space=smem),
            pl.BlockSpec((Bd * 9,), lambda i: (0,), memory_space=smem),
            pl.BlockSpec((Bd * 3,), lambda i: (0,), memory_space=smem),
            pl.BlockSpec((Bd, 3, N), lambda i: (0, 0, 0)),
            pl.BlockSpec((Bd, 1, N), lambda i: (0, 0, 0)),
            pl.BlockSpec((Bd, 3, N), lambda i: (0, 0, 0)),
        ],
        out_specs=pl.BlockSpec((Bd, 3, N), lambda i: (0, 0, 0)),
        compiler_params=pltpu.CompilerParams(dimension_semantics=("arbitrary",)),
    )(params, R_flat, t_flat, x_b3n, mask_b1n, eps_b3n)


# ===========================  plain-JAX glue  ================================
def _edm_step_scalars(c_prev, c_tau, gamma):
    """Per-step scalar preconditioning (runs inside the jitted scan body; tiny)."""
    t_hat = c_prev * (gamma + 1.0)
    xi_scale = NOISE_SCALE_LAMBDA * jnp.sqrt(
        jnp.maximum(t_hat * t_hat - c_prev * c_prev, 0.0))
    scale_skip = (SIGMA_DATA * SIGMA_DATA) / (t_hat * t_hat + SIGMA_DATA * SIGMA_DATA)
    step_scale = STEP_SCALE_ETA * (c_tau - t_hat) / t_hat
    return jnp.stack([jnp.asarray(xi_scale), jnp.asarray(scale_skip),
                      jnp.asarray(step_scale)]).astype(jnp.float32)


def random_rotation_matrix(key, batch_size):
    angles = jax.random.uniform(key, (batch_size, 3), jnp.float32) * 2.0 * jnp.pi
    s = jnp.sin(angles)
    c = jnp.cos(angles)
    row0 = jnp.stack([c[:, 0] * c[:, 1],
                      c[:, 0] * s[:, 1] * s[:, 2] - s[:, 0] * c[:, 2],
                      c[:, 0] * s[:, 1] * c[:, 2] + s[:, 0] * s[:, 2]], axis=-1)
    row1 = jnp.stack([s[:, 0] * c[:, 1],
                      s[:, 0] * s[:, 1] * s[:, 2] + c[:, 0] * c[:, 2],
                      s[:, 0] * s[:, 1] * c[:, 2] - c[:, 0] * s[:, 2]], axis=-1)
    row2 = jnp.stack([-s[:, 1],
                      c[:, 1] * s[:, 2],
                      c[:, 1] * c[:, 2]], axis=-1)
    return jnp.stack([row0, row1, row2], axis=-2)      # (B, 3, 3)


def noise_schedule():
    inv_rho = 1.0 / RHO
    t = jnp.linspace(0.0, 1.0, NO_SAMPLE_STEPS_T + 1)
    t = SIGMA_DATA * (SIGMA_MAX ** inv_rho
                      + t * (SIGMA_MIN ** inv_rho - SIGMA_MAX ** inv_rho)) ** RHO
    return jnp.concatenate([t, jnp.zeros_like(t[:1])])


def reference_step(x_bn3, mask_bn, R, tvec, eps_bn3, c_prev, c_tau, gamma):
    """Pure-JAX reference of one sampling step (literal PyTorch math, r_update = 0)."""
    maskf = mask_bn[..., None]
    denom = jnp.clip(jnp.sum(mask_bn, axis=-1, keepdims=True), min=1.0)[..., None]
    x_mean = jnp.sum(x_bn3 * maskf, axis=-2, keepdims=True) / denom
    xc = (x_bn3 - x_mean) * maskf
    x_aug = (jnp.einsum('bni,bji->bnj', xc, R) + tvec[:, None, :]) * maskf
    t_hat = c_prev * (gamma + 1.0)
    xi_scale = NOISE_SCALE_LAMBDA * jnp.sqrt(
        jnp.maximum(t_hat * t_hat - c_prev * c_prev, 0.0))
    x_noisy = x_aug + xi_scale * eps_bn3            # reference leaves noise unmasked
    scale_skip = SIGMA_DATA ** 2 / (t_hat ** 2 + SIGMA_DATA ** 2)
    x_denoised = scale_skip * x_noisy               # r_update (DiffusionModule) stub = 0
    delta = (x_noisy - x_denoised) / t_hat
    return x_noisy + STEP_SCALE_ETA * (c_tau - t_hat) * delta


@functools.partial(jax.jit, static_argnames=("diffusion_batch_size",))
def sample_diffusion(key, ref_pos_bn3, dense_atom_mask_bn, diffusion_batch_size=2):
    """IntelliFold.sample_diffusion with one fused Pallas kernel per step, under
    jit + lax.scan (single compiled kernel serves all steps).

    TODO(synk): aggregate_fn / reverse_fn (ragged atom aggregation) are not provided;
                identity aggregation is used here.
    TODO(synk): BackboneTrunk / DiffusionModule / ConfidenceHead are not provided; the
                diffusion r_update is stubbed to zero inside the fused kernel.  When the
                DiffusionModule exists, the kernel boundary moves: the fused kernel would
                emit x_noisy, the module runs, and a small second kernel applies the
                skip/out scaling + Euler update.
    """
    schedule = noise_schedule()                       # (T+2,)
    n_steps = schedule.shape[0] - 1                   # static
    B, N, _ = ref_pos_bn3.shape
    Bd = B * diffusion_batch_size

    key, k_init = jax.random.split(key)
    x0 = schedule[0] * jax.random.normal(k_init, (B, N, 3), jnp.float32)
    x = jnp.repeat(x0, diffusion_batch_size, axis=0)                    # (Bd, N, 3)
    mask = jnp.repeat(dense_atom_mask_bn, diffusion_batch_size, axis=0) # (Bd, N)

    x_b3n = jnp.transpose(x, (0, 2, 1))                                 # (Bd, 3, N)
    mask_b1n = mask[:, None, :].astype(jnp.float32)                     # (Bd, 1, N)

    c_prev_arr = schedule[:-1]                                          # (T,)
    c_tau_arr = schedule[1:]                                            # (T,)
    step_keys = jax.random.split(key, n_steps)                          # (T, ...)

    def step_fn(x_carry, step_in):
        c_prev, c_tau, k_step = step_in
        gamma = jnp.where(c_tau > GAMMA_MIN, GAMMA_0, 0.0)
        params = _edm_step_scalars(c_prev, c_tau, gamma)

        kr, kt, kn = jax.random.split(k_step, 3)
        R = random_rotation_matrix(kr, Bd)                              # (Bd, 3, 3)
        tvec = jax.random.normal(kt, (Bd, 3), jnp.float32) * S_TRANS
        # TODO(synk): eps could be generated in-kernel (pltpu.prng_seed + stateful draws)
        #             to save one HBM input per step; kept as a jax.random input to
        #             preserve an exact standard-normal distribution.
        eps = jax.random.normal(kn, (Bd, 3, N), jnp.float32)

        x_next = fused_diffusion_step(
            x_carry, mask_b1n, eps, params,
            R.reshape(Bd * 9), tvec.reshape(Bd * 3))
        return x_next, None

    x_b3n, _ = jax.lax.scan(step_fn, x_b3n, (c_prev_arr, c_tau_arr, step_keys))
    return jnp.transpose(x_b3n, (0, 2, 1))                              # (Bd, N, 3)


# ================================  demo  =====================================
if __name__ == "__main__":
    key = jax.random.PRNGKey(0)
    B, N = 1, 128                       # N on the 128-lane axis
    diffusion_batch_size = 2
    Bd = B * diffusion_batch_size

    k1, k2, k3, k4 = jax.random.split(key, 4)
    ref_pos = jax.random.normal(k1, (B, N, 3), jnp.float32) * 5.0
    n_valid = 100
    pred_dense_atom_mask = (jnp.arange(N)[None, :] < n_valid).astype(jnp.float32)  # (B, N)

    # --- correctness: fused step kernel vs pure-JAX reference (noise path active) ---
    schedule_np = np.asarray(noise_schedule())
    c_prev_t, c_tau_t = float(schedule_np[1]), float(schedule_np[2])
    gamma_t = GAMMA_0 if c_tau_t > GAMMA_MIN else 0.0

    x_test = jax.random.normal(k2, (Bd, N, 3), jnp.float32)
    mask_bd = jnp.repeat(pred_dense_atom_mask, diffusion_batch_size, axis=0)        # (Bd, N)
    kr, kt, kn = jax.random.split(k3, 3)
    R_test = random_rotation_matrix(kr, Bd)
    t_test = jax.random.normal(kt, (Bd, 3), jnp.float32) * S_TRANS
    eps_test = jax.random.normal(kn, (Bd, N, 3), jnp.float32)

    params_test = _edm_step_scalars(c_prev_t, c_tau_t, gamma_t)
    out_kernel = fused_diffusion_step(
        jnp.transpose(x_test, (0, 2, 1)),
        mask_bd[:, None, :],
        jnp.transpose(eps_test, (0, 2, 1)),
        params_test,
        R_test.reshape(Bd * 9),
        t_test.reshape(Bd * 3))
    out_kernel = jnp.transpose(out_kernel, (0, 2, 1))                               # (Bd, N, 3)

    out_ref = reference_step(x_test, mask_bd, R_test, t_test, eps_test,
                             c_prev_t, c_tau_t, gamma_t)
    out_ref = out_ref * mask_bd[..., None]   # kernel keeps padded atoms at exactly zero
    np.testing.assert_allclose(np.asarray(out_kernel), np.asarray(out_ref),
                               rtol=1e-4, atol=1e-2)

    # --- full sampling loop: jit + lax.scan, one compiled fused kernel per step ---
    x_predicted = sample_diffusion(k4, ref_pos, pred_dense_atom_mask,
                                   diffusion_batch_size=diffusion_batch_size)
    x_predicted = jax.block_until_ready(x_predicted)
    assert x_predicted.shape == (Bd, N, 3)
    assert bool(jnp.all(jnp.isfinite(x_predicted)))

    print("KERNEL_OK")
</pallas_src>

<mosaic_0001>
module attributes {stable_mosaic.version = 11 : i64} {
  func.func @_fused_diffusion_step_kernel(%arg0: i32, %arg1: memref<3xf32, #tpu.memory_space<smem>>, %arg2: memref<18xf32, #tpu.memory_space<smem>>, %arg3: memref<6xf32, #tpu.memory_space<smem>>, %arg4: memref<2x3x128xf32, #tpu.memory_space<vmem>>, %arg5: memref<2x1x128xf32, #tpu.memory_space<vmem>>, %arg6: memref<2x3x128xf32, #tpu.memory_space<vmem>>, %arg7: memref<2x3x128xf32, #tpu.memory_space<vmem>>) attributes {dimension_semantics = [#tpu.dimension_semantics<arbitrary>], iteration_bounds = array<i64: 1>, scalar_prefetch = 0 : i64, scratch_operands = 0 : i64, tpu.core_type = #tpu.core_type<tc>, window_params = [{transform_indices = @transform_0, window_bounds = array<i64: 3>}, {transform_indices = @transform_1, window_bounds = array<i64: 18>}, {transform_indices = @transform_2, window_bounds = array<i64: 6>}, {pipeline_mode = #tpu.pipeline_mode<synchronous>, transform_indices = @transform_3, window_bounds = array<i64: 2, 3, 128>}, {pipeline_mode = #tpu.pipeline_mode<synchronous>, transform_indices = @transform_4, window_bounds = array<i64: 2, 1, 128>}, {pipeline_mode = #tpu.pipeline_mode<synchronous>, transform_indices = @transform_5, window_bounds = array<i64: 2, 3, 128>}, {pipeline_mode = #tpu.pipeline_mode<synchronous>, transform_indices = @transform_6, window_bounds = array<i64: 2, 3, 128>}]} {
    %c0 = arith.constant 0 : index
    %0 = memref.load %arg1[%c0] : memref<3xf32, #tpu.memory_space<smem>>
    %c1 = arith.constant 1 : index
    %1 = memref.load %arg1[%c1] : memref<3xf32, #tpu.memory_space<smem>>
    %c2 = arith.constant 2 : index
    %2 = memref.load %arg1[%c2] : memref<3xf32, #tpu.memory_space<smem>>
    %c0_0 = arith.constant 0 : index
    %c0_1 = arith.constant 0 : index
    %c0_2 = arith.constant 0 : index
    %3 = vector.load %arg4[%c0_0, %c0_1, %c0_2] : memref<2x3x128xf32, #tpu.memory_space<vmem>>, vector<2x3x128xf32>
    %c0_3 = arith.constant 0 : index
    %c0_4 = arith.constant 0 : index
    %c0_5 = arith.constant 0 : index
    %4 = vector.load %arg5[%c0_3, %c0_4, %c0_5] : memref<2x1x128xf32, #tpu.memory_space<vmem>>, vector<2x1x128xf32>
    %c0_6 = arith.constant 0 : index
    %c0_7 = arith.constant 0 : index
    %c0_8 = arith.constant 0 : index
    %5 = vector.load %arg6[%c0_6, %c0_7, %c0_8] : memref<2x3x128xf32, #tpu.memory_space<vmem>>, vector<2x3x128xf32>
    %cst = arith.constant dense<0.000000e+00> : vector<2x1xf32>
    %6 = vector.multi_reduction <add>, %4, %cst [2] : vector<2x1x128xf32> to vector<2x1xf32>
    %7 = vector.shape_cast %6 : vector<2x1xf32> to vector<2x1x1xf32>
    %cst_9 = arith.constant 1.000000e+00 : f32
    %8 = vector.broadcast %cst_9 : f32 to vector<2x1x1xf32>
    %9 = arith.maximumf %7, %8 : vector<2x1x1xf32>
    %10 = vector.broadcast %4 : vector<2x1x128xf32> to vector<2x3x128xf32>
    %11 = arith.mulf %3, %10 : vector<2x3x128xf32>
    %cst_10 = arith.constant dense<0.000000e+00> : vector<2x3xf32>
    %12 = vector.multi_reduction <add>, %11, %cst_10 [2] : vector<2x3x128xf32> to vector<2x3xf32>
    %13 = vector.shape_cast %12 : vector<2x3xf32> to vector<2x3x1xf32>
    %14 = vector.broadcast %9 : vector<2x1x1xf32> to vector<2x3x1xf32>
    %15 = arith.divf %13, %14 : vector<2x3x1xf32>
    %16 = vector.broadcast %15 : vector<2x3x1xf32> to vector<2x3x128xf32>
    %17 = arith.subf %3, %16 : vector<2x3x128xf32>
    %18 = vector.broadcast %4 : vector<2x1x128xf32> to vector<2x3x128xf32>
    %19 = arith.mulf %17, %18 : vector<2x3x128xf32>
    %20 = vector.extract_strided_slice %19 {offsets = [0, 0, 0], sizes = [1, 1, 128], strides = [1, 1, 1]} : vector<2x3x128xf32> to vector<1x1x128xf32>
    %21 = vector.shape_cast %20 : vector<1x1x128xf32> to vector<1x128xf32>
    %22 = vector.extract_strided_slice %19 {offsets = [0, 1, 0], sizes = [1, 1, 128], strides = [1, 1, 1]} : vector<2x3x128xf32> to vector<1x1x128xf32>
    %23 = vector.shape_cast %22 : vector<1x1x128xf32> to vector<1x128xf32>
    %24 = vector.extract_strided_slice %19 {offsets = [0, 2, 0], sizes = [1, 1, 128], strides = [1, 1, 1]} : vector<2x3x128xf32> to vector<1x1x128xf32>
    %25 = vector.shape_cast %24 : vector<1x1x128xf32> to vector<1x128xf32>
    %26 = vector.extract_strided_slice %4 {offsets = [0, 0, 0], sizes = [1, 1, 128], strides = [1, 1, 1]} : vector<2x1x128xf32> to vector<1x1x128xf32>
    %27 = vector.shape_cast %26 : vector<1x1x128xf32> to vector<1x128xf32>
    %c0_11 = arith.constant 0 : index
    %28 = memref.load %arg2[%c0_11] : memref<18xf32, #tpu.memory_space<smem>>
    %c1_12 = arith.constant 1 : index
    %29 = memref.load %arg2[%c1_12] : memref<18xf32, #tpu.memory_space<smem>>
    %c2_13 = arith.constant 2 : index
    %30 = memref.load %arg2[%c2_13] : memref<18xf32, #tpu.memory_space<smem>>
    %c0_14 = arith.constant 0 : index
    %31 = memref.load %arg3[%c0_14] : memref<6xf32, #tpu.memory_space<smem>>
    %32 = vector.broadcast %28 : f32 to vector<1x128xf32>
    %33 = arith.mulf %32, %21 : vector<1x128xf32>
    %34 = vector.broadcast %29 : f32 to vector<1x128xf32>
    %35 = arith.mulf %34, %23 : vector<1x128xf32>
    %36 = arith.addf %33, %35 : vector<1x128xf32>
    %37 = vector.broadcast %30 : f32 to vector<1x128xf32>
    %38 = arith.mulf %37, %25 : vector<1x128xf32>
    %39 = arith.addf %36, %38 : vector<1x128xf32>
    %40 = vector.broadcast %31 : f32 to vector<1x128xf32>
    %41 = arith.addf %39, %40 : vector<1x128xf32>
    %42 = arith.mulf %41, %27 : vector<1x128xf32>
    %43 = vector.extract_strided_slice %5 {offsets = [0, 0, 0], sizes = [1, 1, 128], strides = [1, 1, 1]} : vector<2x3x128xf32> to vector<1x1x128xf32>
    %44 = vector.shape_cast %43 : vector<1x1x128xf32> to vector<1x128xf32>
    %45 = vector.broadcast %0 : f32 to vector<1x128xf32>
    %46 = arith.mulf %45, %44 : vector<1x128xf32>
    %47 = arith.mulf %46, %27 : vector<1x128xf32>
    %48 = arith.addf %42, %47 : vector<1x128xf32>
    %49 = vector.broadcast %1 : f32 to vector<1x128xf32>
    %50 = arith.mulf %49, %48 : vector<1x128xf32>
    %51 = arith.subf %48, %50 : vector<1x128xf32>
    %52 = vector.broadcast %2 : f32 to vector<1x128xf32>
    %53 = arith.mulf %52, %51 : vector<1x128xf32>
    %54 = arith.addf %48, %53 : vector<1x128xf32>
    %c0_15 = arith.constant 0 : index
    %c0_16 = arith.constant 0 : index
    %c0_17 = arith.constant 0 : index
    %55 = vector.load %arg7[%c0_15, %c0_16, %c0_17] : memref<2x3x128xf32, #tpu.memory_space<vmem>>, vector<1x1x128xf32>
    %56 = vector.shape_cast %55 : vector<1x1x128xf32> to vector<1x128xf32>
    %57 = vector.shape_cast %54 : vector<1x128xf32> to vector<1x1x128xf32>
    tpu.vector_store %arg7[%c0_15, %c0_16, %c0_17], %57 {strides = array<i32>} : memref<2x3x128xf32, #tpu.memory_space<vmem>>, vector<1x1x128xf32>,
    %c3 = arith.constant 3 : index
    %58 = memref.load %arg2[%c3] : memref<18xf32, #tpu.memory_space<smem>>
    %c4 = arith.constant 4 : index
    %59 = memref.load %arg2[%c4] : memref<18xf32, #tpu.memory_space<smem>>
    %c5 = arith.constant 5 : index
    %60 = memref.load %arg2[%c5] : memref<18xf32, #tpu.memory_space<smem>>
    %c1_18 = arith.constant 1 : index
    %61 = memref.load %arg3[%c1_18] : memref<6xf32, #tpu.memory_space<smem>>
    %62 = vector.broadcast %58 : f32 to vector<1x128xf32>
    %63 = arith.mulf %62, %21 : vector<1x128xf32>
    %64 = vector.broadcast %59 : f32 to vector<1x128xf32>
    %65 = arith.mulf %64, %23 : vector<1x128xf32>
    %66 = arith.addf %63, %65 : vector<1x128xf32>
    %67 = vector.broadcast %60 : f32 to vector<1x128xf32>
    %68 = arith.mulf %67, %25 : vector<1x128xf32>
    %69 = arith.addf %66, %68 : vector<1x128xf32>
    %70 = vector.broadcast %61 : f32 to vector<1x128xf32>
    %71 = arith.addf %69, %70 : vector<1x128xf32>
    %72 = arith.mulf %71, %27 : vector<1x128xf32>
    %73 = vector.extract_strided_slice %5 {offsets = [0, 1, 0], sizes = [1, 1, 128], strides = [1, 1, 1]} : vector<2x3x128xf32> to vector<1x1x128xf32>
    %74 = vector.shape_cast %73 : vector<1x1x128xf32> to vector<1x128xf32>
    %75 = vector.broadcast %0 : f32 to vector<1x128xf32>
    %76 = arith.mulf %75, %74 : vector<1x128xf32>
    %77 = arith.mulf %76, %27 : vector<1x128xf32>
    %78 = arith.addf %72, %77 : vector<1x128xf32>
    %79 = vector.broadcast %1 : f32 to vector<1x128xf32>
    %80 = arith.mulf %79, %78 : vector<1x128xf32>
    %81 = arith.subf %78, %80 : vector<1x128xf32>
    %82 = vector.broadcast %2 : f32 to vector<1x128xf32>
    %83 = arith.mulf %82, %81 : vector<1x128xf32>
    %84 = arith.addf %78, %83 : vector<1x128xf32>
    %c0_19 = arith.constant 0 : index
    %c1_20 = arith.constant 1 : index
    %c0_21 = arith.constant 0 : index
    %85 = vector.load %arg7[%c0_19, %c1_20, %c0_21] : memref<2x3x128xf32, #tpu.memory_space<vmem>>, vector<1x1x128xf32>
    %86 = vector.shape_cast %85 : vector<1x1x128xf32> to vector<1x128xf32>
    %87 = vector.shape_cast %84 : vector<1x128xf32> to vector<1x1x128xf32>
    tpu.vector_store %arg7[%c0_19, %c1_20, %c0_21], %87 {strides = array<i32>} : memref<2x3x128xf32, #tpu.memory_space<vmem>>, vector<1x1x128xf32>,
    %c6 = arith.constant 6 : index
    %88 = memref.load %arg2[%c6] : memref<18xf32, #tpu.memory_space<smem>>
    %c7 = arith.constant 7 : index
    %89 = memref.load %arg2[%c7] : memref<18xf32, #tpu.memory_space<smem>>
    %c8 = arith.constant 8 : index
    %90 = memref.load %arg2[%c8] : memref<18xf32, #tpu.memory_space<smem>>
    %c2_22 = arith.constant 2 : index
    %91 = memref.load %arg3[%c2_22] : memref<6xf32, #tpu.memory_space<smem>>
    %92 = vector.broadcast %88 : f32 to vector<1x128xf32>
    %93 = arith.mulf %92, %21 : vector<1x128xf32>
    %94 = vector.broadcast %89 : f32 to vector<1x128xf32>
    %95 = arith.mulf %94, %23 : vector<1x128xf32>
    %96 = arith.addf %93, %95 : vector<1x128xf32>
    %97 = vector.broadcast %90 : f32 to vector<1x128xf32>
    %98 = arith.mulf %97, %25 : vector<1x128xf32>
    %99 = arith.addf %96, %98 : vector<1x128xf32>
    %100 = vector.broadcast %91 : f32 to vector<1x128xf32>
    %101 = arith.addf %99, %100 : vector<1x128xf32>
    %102 = arith.mulf %101, %27 : vector<1x128xf32>
    %103 = vector.extract_strided_slice %5 {offsets = [0, 2, 0], sizes = [1, 1, 128], strides = [1, 1, 1]} : vector<2x3x128xf32> to vector<1x1x128xf32>
    %104 = vector.shape_cast %103 : vector<1x1x128xf32> to vector<1x128xf32>
    %105 = vector.broadcast %0 : f32 to vector<1x128xf32>
    %106 = arith.mulf %105, %104 : vector<1x128xf32>
    %107 = arith.mulf %106, %27 : vector<1x128xf32>
    %108 = arith.addf %102, %107 : vector<1x128xf32>
    %109 = vector.broadcast %1 : f32 to vector<1x128xf32>
    %110 = arith.mulf %109, %108 : vector<1x128xf32>
    %111 = arith.subf %108, %110 : vector<1x128xf32>
    %112 = vector.broadcast %2 : f32 to vector<1x128xf32>
    %113 = arith.mulf %112, %111 : vector<1x128xf32>
    %114 = arith.addf %108, %113 : vector<1x128xf32>
    %c0_23 = arith.constant 0 : index
    %c2_24 = arith.constant 2 : index
    %c0_25 = arith.constant 0 : index
    %115 = vector.load %arg7[%c0_23, %c2_24, %c0_25] : memref<2x3x128xf32, #tpu.memory_space<vmem>>, vector<1x1x128xf32>
    %116 = vector.shape_cast %115 : vector<1x1x128xf32> to vector<1x128xf32>
    %117 = vector.shape_cast %114 : vector<1x128xf32> to vector<1x1x128xf32>
    tpu.vector_store %arg7[%c0_23, %c2_24, %c0_25], %117 {strides = array<i32>} : memref<2x3x128xf32, #tpu.memory_space<vmem>>, vector<1x1x128xf32>,
    %118 = vector.extract_strided_slice %19 {offsets = [1, 0, 0], sizes = [1, 1, 128], strides = [1, 1, 1]} : vector<2x3x128xf32> to vector<1x1x128xf32>
    %119 = vector.shape_cast %118 : vector<1x1x128xf32> to vector<1x128xf32>
    %120 = vector.extract_strided_slice %19 {offsets = [1, 1, 0], sizes = [1, 1, 128], strides = [1, 1, 1]} : vector<2x3x128xf32> to vector<1x1x128xf32>
    %121 = vector.shape_cast %120 : vector<1x1x128xf32> to vector<1x128xf32>
    %122 = vector.extract_strided_slice %19 {offsets = [1, 2, 0], sizes = [1, 1, 128], strides = [1, 1, 1]} : vector<2x3x128xf32> to vector<1x1x128xf32>
    %123 = vector.shape_cast %122 : vector<1x1x128xf32> to vector<1x128xf32>
    %124 = vector.extract_strided_slice %4 {offsets = [1, 0, 0], sizes = [1, 1, 128], strides = [1, 1, 1]} : vector<2x1x128xf32> to vector<1x1x128xf32>
    %125 = vector.shape_cast %124 : vector<1x1x128xf32> to vector<1x128xf32>
    %c9 = arith.constant 9 : index
    %126 = memref.load %arg2[%c9] : memref<18xf32, #tpu.memory_space<smem>>
    %c10 = arith.constant 10 : index
    %127 = memref.load %arg2[%c10] : memref<18xf32, #tpu.memory_space<smem>>
    %c11 = arith.constant 11 : index
    %128 = memref.load %arg2[%c11] : memref<18xf32, #tpu.memory_space<smem>>
    %c3_26 = arith.constant 3 : index
    %129 = memref.load %arg3[%c3_26] : memref<6xf32, #tpu.memory_space<smem>>
    %130 = vector.broadcast %126 : f32 to vector<1x128xf32>
    %131 = arith.mulf %130, %119 : vector<1x128xf32>
    %132 = vector.broadcast %127 : f32 to vector<1x128xf32>
    %133 = arith.mulf %132, %121 : vector<1x128xf32>
    %134 = arith.addf %131, %133 : vector<1x128xf32>
    %135 = vector.broadcast %128 : f32 to vector<1x128xf32>
    %136 = arith.mulf %135, %123 : vector<1x128xf32>
    %137 = arith.addf %134, %136 : vector<1x128xf32>
    %138 = vector.broadcast %129 : f32 to vector<1x128xf32>
    %139 = arith.addf %137, %138 : vector<1x128xf32>
    %140 = arith.mulf %139, %125 : vector<1x128xf32>
    %141 = vector.extract_strided_slice %5 {offsets = [1, 0, 0], sizes = [1, 1, 128], strides = [1, 1, 1]} : vector<2x3x128xf32> to vector<1x1x128xf32>
    %142 = vector.shape_cast %141 : vector<1x1x128xf32> to vector<1x128xf32>
    %143 = vector.broadcast %0 : f32 to vector<1x128xf32>
    %144 = arith.mulf %143, %142 : vector<1x128xf32>
    %145 = arith.mulf %144, %125 : vector<1x128xf32>
    %146 = arith.addf %140, %145 : vector<1x128xf32>
    %147 = vector.broadcast %1 : f32 to vector<1x128xf32>
    %148 = arith.mulf %147, %146 : vector<1x128xf32>
    %149 = arith.subf %146, %148 : vector<1x128xf32>
    %150 = vector.broadcast %2 : f32 to vector<1x128xf32>
    %151 = arith.mulf %150, %149 : vector<1x128xf32>
    %152 = arith.addf %146, %151 : vector<1x128xf32>
    %c1_27 = arith.constant 1 : index
    %c0_28 = arith.constant 0 : index
    %c0_29 = arith.constant 0 : index
    %153 = vector.load %arg7[%c1_27, %c0_28, %c0_29] : memref<2x3x128xf32, #tpu.memory_space<vmem>>, vector<1x1x128xf32>
    %154 = vector.shape_cast %153 : vector<1x1x128xf32> to vector<1x128xf32>
    %155 = vector.shape_cast %152 : vector<1x128xf32> to vector<1x1x128xf32>
    tpu.vector_store %arg7[%c1_27, %c0_28, %c0_29], %155 {strides = array<i32>} : memref<2x3x128xf32, #tpu.memory_space<vmem>>, vector<1x1x128xf32>,
    %c12 = arith.constant 12 : index
    %156 = memref.load %arg2[%c12] : memref<18xf32, #tpu.memory_space<smem>>
    %c13 = arith.constant 13 : index
    %157 = memref.load %arg2[%c13] : memref<18xf32, #tpu.memory_space<smem>>
    %c14 = arith.constant 14 : index
    %158 = memref.load %arg2[%c14] : memref<18xf32, #tpu.memory_space<smem>>
    %c4_30 = arith.constant 4 : index
    %159 = memref.load %arg3[%c4_30] : memref<6xf32, #tpu.memory_space<smem>>
    %160 = vector.broadcast %156 : f32 to vector<1x128xf32>
    %161 = arith.mulf %160, %119 : vector<1x128xf32>
    %162 = vector.broadcast %157 : f32 to vector<1x128xf32>
    %163 = arith.mulf %162, %121 : vector<1x128xf32>
    %164 = arith.addf %161, %163 : vector<1x128xf32>
    %165 = vector.broadcast %158 : f32 to vector<1x128xf32>
    %166 = arith.mulf %165, %123 : vector<1x128xf32>
    %167 = arith.addf %164, %166 : vector<1x128xf32>
    %168 = vector.broadcast %159 : f32 to vector<1x128xf32>
    %169 = arith.addf %167, %168 : vector<1x128xf32>
    %170 = arith.mulf %169, %125 : vector<1x128xf32>
    %171 = vector.extract_strided_slice %5 {offsets = [1, 1, 0], sizes = [1, 1, 128], strides = [1, 1, 1]} : vector<2x3x128xf32> to vector<1x1x128xf32>
    %172 = vector.shape_cast %171 : vector<1x1x128xf32> to vector<1x128xf32>
    %173 = vector.broadcast %0 : f32 to vector<1x128xf32>
    %174 = arith.mulf %173, %172 : vector<1x128xf32>
    %175 = arith.mulf %174, %125 : vector<1x128xf32>
    %176 = arith.addf %170, %175 : vector<1x128xf32>
    %177 = vector.broadcast %1 : f32 to vector<1x128xf32>
    %178 = arith.mulf %177, %176 : vector<1x128xf32>
    %179 = arith.subf %176, %178 : vector<1x128xf32>
    %180 = vector.broadcast %2 : f32 to vector<1x128xf32>
    %181 = arith.mulf %180, %179 : vector<1x128xf32>
    %182 = arith.addf %176, %181 : vector<1x128xf32>
    %c1_31 = arith.constant 1 : index
    %c1_32 = arith.constant 1 : index
    %c0_33 = arith.constant 0 : index
    %183 = vector.load %arg7[%c1_31, %c1_32, %c0_33] : memref<2x3x128xf32, #tpu.memory_space<vmem>>, vector<1x1x128xf32>
    %184 = vector.shape_cast %183 : vector<1x1x128xf32> to vector<1x128xf32>
    %185 = vector.shape_cast %182 : vector<1x128xf32> to vector<1x1x128xf32>
    tpu.vector_store %arg7[%c1_31, %c1_32, %c0_33], %185 {strides = array<i32>} : memref<2x3x128xf32, #tpu.memory_space<vmem>>, vector<1x1x128xf32>,
    %c15 = arith.constant 15 : index
    %186 = memref.load %arg2[%c15] : memref<18xf32, #tpu.memory_space<smem>>
    %c16 = arith.constant 16 : index
    %187 = memref.load %arg2[%c16] : memref<18xf32, #tpu.memory_space<smem>>
    %c17 = arith.constant 17 : index
    %188 = memref.load %arg2[%c17] : memref<18xf32, #tpu.memory_space<smem>>
    %c5_34 = arith.constant 5 : index
    %189 = memref.load %arg3[%c5_34] : memref<6xf32, #tpu.memory_space<smem>>
    %190 = vector.broadcast %186 : f32 to vector<1x128xf32>
    %191 = arith.mulf %190, %119 : vector<1x128xf32>
    %192 = vector.broadcast %187 : f32 to vector<1x128xf32>
    %193 = arith.mulf %192, %121 : vector<1x128xf32>
    %194 = arith.addf %191, %193 : vector<1x128xf32>
    %195 = vector.broadcast %188 : f32 to vector<1x128xf32>
    %196 = arith.mulf %195, %123 : vector<1x128xf32>
    %197 = arith.addf %194, %196 : vector<1x128xf32>
    %198 = vector.broadcast %189 : f32 to vector<1x128xf32>
    %199 = arith.addf %197, %198 : vector<1x128xf32>
    %200 = arith.mulf %199, %125 : vector<1x128xf32>
    %201 = vector.extract_strided_slice %5 {offsets = [1, 2, 0], sizes = [1, 1, 128], strides = [1, 1, 1]} : vector<2x3x128xf32> to vector<1x1x128xf32>
    %202 = vector.shape_cast %201 : vector<1x1x128xf32> to vector<1x128xf32>
    %203 = vector.broadcast %0 : f32 to vector<1x128xf32>
    %204 = arith.mulf %203, %202 : vector<1x128xf32>
    %205 = arith.mulf %204, %125 : vector<1x128xf32>
    %206 = arith.addf %200, %205 : vector<1x128xf32>
    %207 = vector.broadcast %1 : f32 to vector<1x128xf32>
    %208 = arith.mulf %207, %206 : vector<1x128xf32>
    %209 = arith.subf %206, %208 : vector<1x128xf32>
    %210 = vector.broadcast %2 : f32 to vector<1x128xf32>
    %211 = arith.mulf %210, %209 : vector<1x128xf32>
    %212 = arith.addf %206, %211 : vector<1x128xf32>
    %c1_35 = arith.constant 1 : index
    %c2_36 = arith.constant 2 : index
    %c0_37 = arith.constant 0 : index
    %213 = vector.load %arg7[%c1_35, %c2_36, %c0_37] : memref<2x3x128xf32, #tpu.memory_space<vmem>>, vector<1x1x128xf32>
    %214 = vector.shape_cast %213 : vector<1x1x128xf32> to vector<1x128xf32>
    %215 = vector.shape_cast %212 : vector<1x128xf32> to vector<1x1x128xf32>
    tpu.vector_store %arg7[%c1_35, %c2_36, %c0_37], %215 {strides = array<i32>} : memref<2x3x128xf32, #tpu.memory_space<vmem>>, vector<1x1x128xf32>,
    return
  }
  func.func @transform_0(%arg0: i32) -> i32 {
    %c0_i32 = arith.constant 0 : i32
    %c0_i32_0 = arith.constant 0 : i32
    return %c0_i32 : i32
  }
  func.func @transform_1(%arg0: i32) -> i32 {
    %c0_i32 = arith.constant 0 : i32
    %c0_i32_0 = arith.constant 0 : i32
    return %c0_i32 : i32
  }
  func.func @transform_2(%arg0: i32) -> i32 {
    %c0_i32 = arith.constant 0 : i32
    %c0_i32_0 = arith.constant 0 : i32
    return %c0_i32 : i32
  }
  func.func @transform_3(%arg0: i32) -> (i32, i32, i32) {
    %c0_i32 = arith.constant 0 : i32
    %c0_i32_0 = arith.constant 0 : i32
    %c0_i32_1 = arith.constant 0 : i32
    %c0_i32_2 = arith.constant 0 : i32
    return %c0_i32, %c0_i32_0, %c0_i32_1 : i32, i32, i32
  }
  func.func @transform_4(%arg0: i32) -> (i32, i32, i32) {
    %c0_i32 = arith.constant 0 : i32
    %c0_i32_0 = arith.constant 0 : i32
    %c0_i32_1 = arith.constant 0 : i32
    %c0_i32_2 = arith.constant 0 : i32
    return %c0_i32, %c0_i32_0, %c0_i32_1 : i32, i32, i32
  }
  func.func @transform_5(%arg0: i32) -> (i32, i32, i32) {
    %c0_i32 = arith.constant 0 : i32
    %c0_i32_0 = arith.constant 0 : i32
    %c0_i32_1 = arith.constant 0 : i32
    %c0_i32_2 = arith.constant 0 : i32
    return %c0_i32, %c0_i32_0, %c0_i32_1 : i32, i32, i32
  }
  func.func @transform_6(%arg0: i32) -> (i32, i32, i32) {
    %c0_i32 = arith.constant 0 : i32
    %c0_i32_0 = arith.constant 0 : i32
    %c0_i32_1 = arith.constant 0 : i32
    %c0_i32_2 = arith.constant 0 : i32
    return %c0_i32, %c0_i32_0, %c0_i32_1 : i32, i32, i32
  }
}

</mosaic_0001>

<bundles_post_ra>
// kernel: tpu_custom_call.1
= control target key start
LH: loop header
LB: loop body
LE: loop exit
PB: predicated region body
PF: predicated region fallthrough
CT: control target
= control target key end

     0   :  { %11 = vsyncpa [#allocation3], 0  ;;  %s647_s0 = inlined_call_operand.vmem [shape: f32[3], index: 0, kind: input, shape index: {}]   ;;  %s648_s1 = inlined_call_operand.vmem [shape: f32[18], index: 1, kind: input, shape index: {}]   ;;  %s649_s2 = inlined_call_operand.vmem [shape: f32[6], index: 2, kind: input, shape index: {}]   ;;  %s650_s3 = inlined_call_operand.vmem [shape: f32[2,3,128], index: 3, kind: input, shape index: {}]   ;;  %s651_s4 = inlined_call_operand.vmem [shape: f32[2,1,128], index: 4, kind: input, shape index: {}]   ;;  %s652_s5 = inlined_call_operand.vmem [shape: f32[2,3,128], index: 5, kind: input, shape index: {}]   ;;  %s653_s6 = inlined_call_operand.vmem [shape: f32[2,3,128], index: 6, kind: output, shape index: {}]  }
   0x1   :  { %12 = vsyncpa [#allocation5], 0  ;;  %s27_s23 = sshll.u32 %s648_s1, 4  ;;  %s18_s26 = sshll.u32 %s647_s0, 4  ;;  %s28_s23 = int_to_ptr.vmem [resolvable:$true] %s27_s23  ;;  %s19_s26 = int_to_ptr.vmem [resolvable:$true] %s18_s26 }
   0x2   :  { %s392_s27 = smov [#allocation4]   ;;  %s393_s28 = smov [#allocation2]  }
   0x3   :  { %30 = dma.vmem_to_smem %s28_s23, 16, %s392_s27, [#allocation5]  }
   0x4   :  { %21 = dma.vmem_to_smem %s19_s26, 16, %s393_s28, [#allocation3]  }
   0x5   :  { %s36_s7 = sshll.u32 %s649_s2, 4  ;;  %s394_s8 = smov [#allocation6]   ;;  %s37_s7 = int_to_ptr.vmem [resolvable:$true] %s36_s7 }
   0x6   :  { %39 = dma.vmem_to_smem %s37_s7, 16, %s394_s8, [#allocation5]  }
   0x7   :  { %388 = dma.done.wait [#allocation3], 16  }
   0x8   :  { %389 = vsyncadd [#allocation3], 4294967280 }
   0x9   :  { %390 = dma.done.wait [#allocation5], 32  }
   0xa   :  { %391 = vsyncadd [#allocation5], 4294967264 }
   0xb   :  { %58 = sfence }
   0xc   :  { %v442_v0 = vld [vmem:[%s651_s4] sm:$0x1]  ;;  %vm68_vm0 = vcmask 1040384   ;;  %vm85_vm1 = vcmask 1042432   ;;  %v458_v4 = vld [vmem:[%s651_s4 + $0x1] sm:$0x1] }
   0xd   :  { %v69_v1 = vsel %vm68_vm0, %v442_v0, 0.0  ;;  %v448_v2 = vld [vmem:[%s650_s3] sm:$0x7]  ;;  %v470_v7 = vld [vmem:[%s650_s3 + $0x4] sm:$0x7]  ;;  %v72_v9 = vsel %vm68_vm0, %v458_v4, 0.0 }
   0xe   :  { %70 = vadd.xlane.f32.xlu0 %v69_v1  ;;  %v453_v3 = vld [vmem:[%s651_s4] ss:$0 sm:$0xff]  ;;  %v465_v6 = vld [vmem:[%s651_s4 + $0x1] ss:$0 sm:$0xff]  ;;  %s59_s18 = sld [smem:[#allocation2]] }
   0xf   :  { %v83_v5 = vmul.f32 %v453_v3, %v448_v2  ;;  %v84_v10 = vmul.f32 %v465_v6, %v470_v7  ;;  %s475_s4 = sld [smem:[#allocation4]]  ;;  %v66_v17 = vld [vmem:[%s652_s5] sm:$0x7]  ;;  %v67_v23 = vld [vmem:[%s652_s5 + $0x4] sm:$0x7] }
  0x10   :  { %s477_s19 = sld [smem:[#allocation4 + $0x1]] }
  0x11   :  { %v86_v8 = vsel %vm85_vm1, %v83_v5, 0.0  ;;  %v89_v11 = vsel %vm85_vm1, %v84_v10, 0.0  ;;  %s479_s3 = sld [smem:[#allocation4 + $0x2]] }
  0x12   :  { %87 = vadd.xlane.f32.xlu1 %v86_v8  ;;  %s481_s20 = sld [smem:[#allocation6]] }
  0x13   :  { %s483_s21 = sld [smem:[#allocation4 + $0x3]] }
  0x14   :  { %v149_v18 = vstv %s59_s18  ;;  %s488_s24 = sld [smem:[#allocation4 + $0x4]] }
  0x15   :  { %s492_s25 = sld [smem:[#allocation4 + $0x5]]  ;;  %v150_v22 = vmul.f32 %v149_v18, %v66_v17  ;;  %v241_v26 = vmul.f32 %v149_v18, %v67_v23  ;;  %v132_v42 = vstv %s475_s4 }
  0x16   :  { %73 = vadd.xlane.f32.xlu0 %v72_v9  ;;  %s494_s26 = sld [smem:[#allocation6 + $0x1]]  ;;  %v134_v43 = vstv %s477_s19 }
  0x17   :  { %s500_s29 = sld [smem:[#allocation4 + $0x6]]  ;;  %v509_v29 = vmul.f32 %v453_v3, %v150_v22  ;;  %v518_v32 = vmul.f32 %v150_v22, %v442_v0  ;;  %v521_v33 = vmul.f32 %v241_v26, %v458_v4  ;;  %v526_v36 = vmul.f32 %v465_v6, %v241_v26 }
  0x18   :  { %s502_s30 = sld [smem:[#allocation4 + $0x7]]  ;;  %v140_v44 = vstv %s479_s3  ;;  %v146_v47 = vstv %s481_s20 }
  0x19   :  { %s504_s7 = sld [smem:[#allocation4 + $0x8]]  ;;  %v183_v39 = vrot.slane %v509_v29, 1  ;;  %v212_v40 = vrot.slane %v509_v29, 2  ;;  %v164_v48 = vstv %s483_s21  ;;  %v273_v29 = vrot.slane %v526_v36, 1 }
  0x1a   :  { %90 = vadd.xlane.f32.xlu1 %v89_v11  ;;  %s506_s8 = sld [smem:[#allocation6 + $0x2]]  ;;  %v166_v49 = vstv %s488_s24 }
  0x1b   :  { %s511_s5 = sld [smem:[#allocation4 + $0x9]]  ;;  %v172_v50 = vstv %s492_s25 }
  0x1c   :  { %s513_s1 = sld [smem:[#allocation4 + $0xa]]  ;;  %v178_v55 = vstv %s494_s26 }
  0x1d   :  { %s523_s9 = sld [smem:[#allocation4 + $0xb]]  ;;  %v195_v56 = vstv %s500_s29 }
  0x1e   :  { %s533_s0 = sld [smem:[#allocation2 + $0x1]]  ;;  %v197_v57 = vstv %s502_s30 }
  0x1f   :  { %s537_s10 = sld [smem:[#allocation2 + $0x2]]  ;;  %v203_v58 = vstv %s504_s7 }
  0x20   :  { %s543_s2 = sld [smem:[#allocation4 + $0xc]]  ;;  %v209_v59 = vstv %s506_s8 }
  0x21   :  { %s549_s11 = sld [smem:[#allocation4 + $0xd]]  ;;  %v224_v62 = vstv %s511_s5 }
  0x22   :  { %s555_s12 = sld [smem:[#allocation4 + $0xe]]  ;;  %v226_v63 = vstv %s513_s1 }
  0x23   :  { %s561_s13 = sld [smem:[#allocation4 + $0xf]]  ;;  %v232_v1 = vstv %s523_s9 }
  0x24   :  { %s567_s14 = sld [smem:[#allocation4 + $0x10]] }
  0x25   :  { %s573_s15 = sld [smem:[#allocation4 + $0x11]] }
  0x26   :  { %s577_s16 = sld [smem:[#allocation6 + $0x3]] }
  0x27   :  { %s580_s17 = sld [smem:[#allocation6 + $0x4]] }
  0x28   :  { %s603_s18 = sld [smem:[#allocation6 + $0x5]] }
  0x81   :  { %v71_v12 = vpop.xlane.xlu0 %70 }
  0x82   :  { %v75_v13 = vmax.f32 %v71_v12, 1.0 }
  0x84   :  { %v92_v14 = vperm.slane %v75_v13, 0 }
  0x85   :  { %v88_v35 = vpop.xlane.xlu1 %87 }
  0x86   :  { %348 = vrcp.f32 %v92_v14  ;;  %v105_v25 = vand.u32 2147483648, %v92_v14  ;;  %v103_v28 = vand.u32 2147483647, %v92_v14  ;;  %vm99_vm3 = vweird.f32 %v92_v14 }
  0x88   :  { %v106_v34 = vor.u32 1.1754944e-38, %v105_v25  ;;  %vm104_vm5 = vcmp.eq.f32.partialorder %v103_v28, 8.507059e+37 }
  0x89   :  { %v74_v15 = vpop.xlane.xlu0 %73 }
  0x8a   :  { %v76_v16 = vmax.f32 %v74_v15, 1.0 }
  0x8c   :  { %v349_v19 = vpop.eup %348  ;;  %v490_v20 = vperm.slane %v76_v16, 0 }
  0x8d   :  { %v95_v21 = vmul.f32 %v349_v19, %v92_v14  ;;  %vm100_vm2 = vweird.f32 %v349_v19  ;;  %v91_v13 = vpop.xlane.xlu1 %90 }
  0x8e   :  { %350 = vrcp.f32 %v490_v20  ;;  %vm101_vm4 = vmor %vm99_vm3, %vm100_vm2  ;;  %v118_v53 = vand.u32 2147483647, %v490_v20  ;;  %v120_v54 = vand.u32 2147483648, %v490_v20  ;;  %vm114_vm7 = vweird.f32 %v490_v20 }
  0x8f   :  { %v96_v24 = vsub.f32 1.0, %v95_v21 }
  0x90   :  { %vm569_vm8 = vcmp.eq.f32.partialorder %v118_v53, 8.507059e+37 }
  0x91   :  { %v97_v27 = vmul.f32 %v349_v19, %v96_v24  ;;  %v254_v24 = vstv %s543_s2 }
  0x93   :  { %v98_v30 = vadd.f32 %v349_v19, %v97_v27 }
  0x94   :  { %v515_v31 = vpop.eup %350 }
  0x95   :  { %v102_v37 = vsel %vm101_vm4, %v349_v19, %v98_v30  ;;  %v110_v38 = vmul.f32 %v515_v31, %v490_v20  ;;  %vm115_vm6 = vweird.f32 %v515_v31 }
  0x96   :  { %v107_v41 = vsel %vm104_vm5, %v106_v34, %v102_v37  ;;  %vm116_vm9 = vmor %vm114_vm7, %vm115_vm6  ;;  %v256_v34 = vstv %s549_s11 }
  0x97   :  { %v108_v45 = vmul.f32 %v107_v41, %v88_v35  ;;  %v111_v46 = vsub.f32 1.0, %v110_v38  ;;  %v262_v35 = vstv %s555_s12  ;;  %v589_v38 = vstv %s533_s0 }
  0x99   :  { %v124_v51 = vsub.f32 %v448_v2, %v108_v45  ;;  %v112_v52 = vmul.f32 %v515_v31, %v111_v46  ;;  %v287_v45 = vstv %s567_s14  ;;  %v293_v46 = vstv %s573_s15 }
  0x9b   :  { %v126_v60 = vmul.f32 %v453_v3, %v124_v51  ;;  %v113_v61 = vadd.f32 %v515_v31, %v112_v52  ;;  %v121_v3 = vor.u32 1.1754944e-38, %v120_v54  ;;  %v238_v52 = vstv %s577_s16 }
  0x9c   :  { %v268_v54 = vstv %s580_s17 }
  0x9d   :  { %v135_v2 = vmul.f32 %v134_v43, %v126_v60  ;;  %v141_v5 = vmul.f32 %v140_v44, %v126_v60  ;;  %v133_v9 = vmul.f32 %v132_v42, %v126_v60  ;;  %v167_v10 = vmul.f32 %v166_v49, %v126_v60 }
  0x9e   :  { %v173_v11 = vmul.f32 %v172_v50, %v126_v60  ;;  %v198_v12 = vmul.f32 %v197_v57, %v126_v60  ;;  %v165_v15 = vmul.f32 %v164_v48, %v126_v60  ;;  %v204_v16 = vmul.f32 %v203_v58, %v126_v60 }
  0x9f   :  { %v137_v14 = vrot.slane %v135_v2, 1  ;;  %v117_v17 = vsel %vm116_vm9, %v515_v31, %v113_v61  ;;  %v169_v18 = vrot.slane %v167_v10, 1  ;;  %v196_v19 = vmul.f32 %v195_v56, %v126_v60 }
  0xa0   :  { %v200_v20 = vrot.slane %v198_v12, 1  ;;  %v122_v21 = vsel %vm569_vm8, %v121_v3, %v117_v17  ;;  %v143_v23 = vrot.slane %v141_v5, 2  ;;  %v175_v27 = vrot.slane %v173_v11, 2 }
  0xa1   :  { %v139_v22 = vadd.f32 %v137_v14, %v133_v9  ;;  %v123_v25 = vmul.f32 %v122_v21, %v91_v13  ;;  %v171_v26 = vadd.f32 %v169_v18, %v165_v15  ;;  %v206_v30 = vrot.slane %v204_v16, 2 }
  0xa2   :  { %v202_v28 = vadd.f32 %v200_v20, %v196_v19  ;;  %v285_v43 = vstv %s561_s13  ;;  %v596_v49 = vstv %s537_s10 }
  0xa3   :  { %v145_v31 = vadd.f32 %v143_v23, %v139_v22  ;;  %v125_v37 = vsub.f32 %v470_v7, %v123_v25  ;;  %v177_v41 = vadd.f32 %v175_v27, %v171_v26  ;;  %v299_v23 = vstv %s603_s18 }
  0xa4   :  { %v208_v42 = vadd.f32 %v206_v30, %v202_v28 }
  0xa5   :  { %v147_v44 = vadd.f32 %v146_v47, %v145_v31  ;;  %v127_v48 = vmul.f32 %v465_v6, %v125_v37  ;;  %v179_v50 = vadd.f32 %v178_v55, %v177_v41 }
  0xa6   :  { %v210_v51 = vadd.f32 %v209_v59, %v208_v42 }
  0xa7   :  { %v148_v53 = vmul.f32 %v147_v44, %v442_v0  ;;  %v227_v56 = vmul.f32 %v226_v63, %v127_v48  ;;  %v233_v7 = vmul.f32 %v232_v1, %v127_v48  ;;  %v180_v57 = vmul.f32 %v179_v50, %v442_v0 }
  0xa8   :  { %v211_v58 = vmul.f32 %v210_v51, %v442_v0  ;;  %v225_v47 = vmul.f32 %v224_v62, %v127_v48  ;;  %v257_v60 = vmul.f32 %v256_v34, %v127_v48  ;;  %v255_v2 = vmul.f32 %v254_v24, %v127_v48 }
  0xa9   :  { %v152_v6 = vadd.f32 %v518_v32, %v148_v53  ;;  %v229_v61 = vrot.slane %v227_v56, 1  ;;  %v263_v55 = vmul.f32 %v262_v35, %v127_v48  ;;  %v185_v59 = vadd.f32 %v183_v39, %v180_v57 }
  0xaa   :  { %v214_v63 = vadd.f32 %v212_v40, %v211_v58  ;;  %v235_v1 = vrot.slane %v233_v7, 2  ;;  %v259_v5 = vrot.slane %v257_v60, 1  ;;  %v288_v9 = vmul.f32 %v287_v45, %v127_v48 }
  0xab   :  { %v154_v8 = vmul.f32 %v589_v38, %v152_v6  ;;  %v231_v0 = vadd.f32 %v229_v61, %v225_v47  ;;  %v265_v3 = vrot.slane %v263_v55, 2  ;;  %v186_v62 = vmul.f32 %v185_v59, %v589_v38 }
  0xac   :  { %v215_v32 = vmul.f32 %v214_v63, %v589_v38  ;;  %v261_v10 = vadd.f32 %v259_v5, %v255_v2  ;;  %v294_v11 = vmul.f32 %v293_v46, %v127_v48  ;;  %v286_v39 = vmul.f32 %v285_v43, %v127_v48 }
  0xad   :  { %v155_v12 = vsub.f32 %v152_v6, %v154_v8  ;;  %v237_v13 = vadd.f32 %v235_v1, %v231_v0  ;;  %v290_v14 = vrot.slane %v288_v9, 1  ;;  %v187_v40 = vsub.f32 %v185_v59, %v186_v62 }
  0xae   :  { %v216_v15 = vsub.f32 %v214_v63, %v215_v32  ;;  %v267_v16 = vadd.f32 %v265_v3, %v261_v10  ;;  %v296_v20 = vrot.slane %v294_v11, 2  ;;  %v302_v34 = vrot.slane %v526_v36, 2 }
  0xaf   :  { %v157_v17 = vmul.f32 %v596_v49, %v155_v12  ;;  %v239_v18 = vadd.f32 %v238_v52, %v237_v13  ;;  %v292_v19 = vadd.f32 %v290_v14, %v286_v39  ;;  %v188_v21 = vmul.f32 %v187_v40, %v596_v49 }
  0xb0   :  { %v217_v22 = vmul.f32 %v216_v15, %v596_v49  ;;  %v269_v24 = vadd.f32 %v268_v54, %v267_v16 }
  0xb1   :  { %v158_v25 = vadd.f32 %v157_v17, %v152_v6  ;;  %v240_v26 = vmul.f32 %v239_v18, %v458_v4  ;;  %v298_v27 = vadd.f32 %v296_v20, %v292_v19  ;;  %v189_v28 = vadd.f32 %v188_v21, %v185_v59 }
  0xb2   :  { %v218_v30 = vadd.f32 %v217_v22, %v214_v63  ;;  %v270_v31 = vmul.f32 %v269_v24, %v458_v4 }
  0xb3   :  { %159 = vst [vmem:[%s653_s6] sm:$0x1] %v158_v25  ;;  %v243_v35 = vadd.f32 %v521_v33, %v240_v26  ;;  %v300_v37 = vadd.f32 %v299_v23, %v298_v27 }
  0xb4   :  { %190 = vst [vmem:[%s653_s6 + $0x1] sm:$0x1] %v189_v28  ;;  %v275_v41 = vadd.f32 %v273_v29, %v270_v31 }
  0xb5   :  { %219 = vst [vmem:[%s653_s6 + $0x2] sm:$0x1] %v218_v30  ;;  %v244_v42 = vmul.f32 %v243_v35, %v589_v38  ;;  %v301_v36 = vmul.f32 %v300_v37, %v458_v4 }
  0xb6   :  { %v276_v43 = vmul.f32 %v275_v41, %v589_v38 }
  0xb7   :  { %v245_v44 = vsub.f32 %v243_v35, %v244_v42  ;;  %v304_v45 = vadd.f32 %v302_v34, %v301_v36 }
  0xb8   :  { %v277_v46 = vsub.f32 %v275_v41, %v276_v43 }
  0xb9   :  { %v246_v33 = vmul.f32 %v245_v44, %v596_v49  ;;  %v305_v48 = vmul.f32 %v304_v45, %v589_v38 }
  0xba   :  { %v278_v50 = vmul.f32 %v277_v46, %v596_v49 }
  0xbb   :  { %v247_v51 = vadd.f32 %v246_v33, %v243_v35  ;;  %v306_v52 = vsub.f32 %v304_v45, %v305_v48 }
  0xbc   :  { %v279_v53 = vadd.f32 %v278_v50, %v275_v41 }
  0xbd   :  { %332 = vst [vmem:[%s653_s6 + $0x4] sm:$0x1] %v247_v51  ;;  %v307_v4 = vmul.f32 %v306_v52, %v596_v49 }
  0xbe   :  { %337 = vst [vmem:[%s653_s6 + $0x5] sm:$0x1] %v279_v53 }
  0xbf   :  { %v308_v54 = vadd.f32 %v307_v4, %v304_v45 }
  0xc1   :  { %342 = vst [vmem:[%s653_s6 + $0x6] sm:$0x1] %v308_v54 }
  0xc2   :  { %314 = vsyncpa [#allocation3], 1 }
  0xc3   :  { %315 = vsyncpa [#allocation5], 1 }

</bundles_post_ra>
